<compile_context>
chip_gen: v7x
topology: tpu7x:2x2x1
jax: 0.10.0
libtpu: 0.0.40
codegen_flags: <defaults>
</compile_context>

<pallas_src>
import math
from functools import partial

import jax
import jax.numpy as jnp
from jax import lax
from jax.experimental import pallas as pl
from jax.experimental.pallas import tpu as pltpu


# --------------------------------------------------------------- tile picks --

_TM, _TN, _TK = 512, 512, 1024     # linear-projection tile targets (v6e); v5e/v7x: shrink
_TQ, _TKV = 256, 512               # attention query / key-value tile targets
_VMEM_LIMIT = 64 * 1024 * 1024     # raises v5e's 16 MiB scoped default; halve on v7x
_OPERAND_DTYPE = jnp.bfloat16      # MXU operand dtype (f32 accumulation everywhere)


def _pick_tile(dim, target, align):
    """Largest `align`-multiple <= target that divides `dim`; else the full dim
    (a full-extent block is always a legal BlockSpec)."""
    if dim <= target:
        return dim
    t = (target // align) * align
    while t >= align:
        if dim % t == 0:
            return t
        t -= align
    return dim


# ------------------------------------------------------------ linear kernel --

def _linear_kernel(x_ref, w_ref, b_ref, o_ref, acc_ref):
    # y = x @ W_t + b, tiled over (M, N, K) with a resident f32 accumulator.
    k = pl.program_id(2)

    @pl.when(k == 0)
    def _():
        acc_ref[...] = jnp.zeros_like(acc_ref)

    acc_ref[...] += jnp.dot(x_ref[...], w_ref[...],
                            preferred_element_type=jnp.float32)

    @pl.when(k == pl.num_programs(2) - 1)
    def _():
        # Bias added once, in the K-epilogue, in f32.
        o_ref[...] = (acc_ref[...] + b_ref[...].astype(jnp.float32)
                      ).astype(o_ref.dtype)


def pallas_linear(x, w_t, b, out_dtype):
    """x: [M, K] (bf16), w_t: [K, N] (bf16, pre-transposed), b: [N] (f32)."""
    M, K = x.shape
    K2, N = w_t.shape
    assert K == K2
    tm = _pick_tile(M, _TM, 8)
    tn = _pick_tile(N, _TN, 128)
    tk = _pick_tile(K, _TK, 128)
    grid = (M // tm, N // tn, K // tk)          # reduction (K) axis last
    return pl.pallas_call(
        _linear_kernel,
        out_shape=jax.ShapeDtypeStruct((M, N), out_dtype),
        grid_spec=pltpu.PrefetchScalarGridSpec(
            num_scalar_prefetch=0,
            grid=grid,
            in_specs=[
                pl.BlockSpec((tm, tk), lambda i, j, k: (i, k)),
                pl.BlockSpec((tk, tn), lambda i, j, k: (k, j)),
                pl.BlockSpec((1, tn), lambda i, j, k: (0, j)),
            ],
            out_specs=pl.BlockSpec((tm, tn), lambda i, j, k: (i, j)),
            scratch_shapes=[pltpu.VMEM((tm, tn), jnp.float32)],
        ),
        compiler_params=pltpu.CompilerParams(
            dimension_semantics=("parallel", "parallel", "arbitrary"),
            vmem_limit_bytes=_VMEM_LIMIT),
    )(x, w_t, b.reshape(1, N))


# --------------------------------------------------------- attention kernel --

def _flash_attn_kernel(q_ref, k_ref, v_ref, o_ref, m_ref, l_ref, acc_ref,
                       *, factor):
    # Per grid step (b, h, qi, ki): q_ref (tq, D), k_ref/v_ref (tkv, D) bf16.
    # Online-softmax state (m, l, acc) in f32 VMEM scratch across the kv axis.
    ki = pl.program_id(3)

    @pl.when(ki == 0)
    def _():
        m_ref[...] = jnp.full_like(m_ref, -jnp.inf)
        l_ref[...] = jnp.zeros_like(l_ref)
        acc_ref[...] = jnp.zeros_like(acc_ref)

    # Fold 1/sqrt(D) into q (tq*D multiplies instead of tq*tkv per kv step).
    q = q_ref[...] * factor                                   # (tq, D), bf16
    k = k_ref[...]                                            # (tkv, D), bf16
    v = v_ref[...]                                            # (tkv, D), bf16

    # scores = q @ k^T without an explicit transpose (contract D on both sides).
    s = lax.dot_general(q, k, (((1,), (1,)), ((), ())),
                        preferred_element_type=jnp.float32)   # (tq, tkv), f32

    # TODO(synk): optional attention mask and softmax dropout (training path)
    # are not implemented; this matches the module's inference path with
    # mask=None and dropout in eval mode.

    m_prev = m_ref[...]                                       # (tq, 1)
    m_new = jnp.maximum(m_prev, jnp.max(s, axis=-1, keepdims=True))
    alpha = jnp.exp(m_prev - m_new)                           # f32 elementwise
    p = jnp.exp(s - m_new)                                    # (tq, tkv), f32
    l_ref[...] = alpha * l_ref[...] + jnp.sum(p, axis=-1, keepdims=True)
    pv = lax.dot_general(p.astype(v.dtype), v, (((1,), (0,)), ((), ())),
                         preferred_element_type=jnp.float32)  # (tq, D), f32
    acc_ref[...] = alpha * acc_ref[...] + pv
    m_ref[...] = m_new

    @pl.when(ki == pl.num_programs(3) - 1)
    def _():
        inv_l = pl.reciprocal(l_ref[...], approx=True)        # EUP slot, ~free
        o_ref[...] = (acc_ref[...] * inv_l).astype(o_ref.dtype)


def pallas_attention(q_arr, k_arr, v_arr, *, seq_len, batch, head_num, head_dim,
                     factor, head_offsets):
    """q/k/v arrays are (S, B, n_heads_total, D); per-head blocks are selected
    via head_offsets (0,0,0 for separate tensors; (0,H,2H) for a packed QKV)."""
    S, B, H, D = seq_len, batch, head_num, head_dim
    tq = _pick_tile(S, _TQ, 8)
    tkv = _pick_tile(S, _TKV, 8)   # modest S -> tkv == S and the kv axis collapses
    q_off, k_off, v_off = head_offsets

    def q_map(b, h, qi, ki):
        return (qi, b, q_off + h, 0)

    def k_map(b, h, qi, ki):
        return (ki, b, k_off + h, 0)

    def v_map(b, h, qi, ki):
        return (ki, b, v_off + h, 0)

    def o_map(b, h, qi, ki):
        return (qi, b, h, 0)

    q_spec = pl.BlockSpec((tq, None, None, D), q_map)
    k_spec = pl.BlockSpec((tkv, None, None, D), k_map)
    v_spec = pl.BlockSpec((tkv, None, None, D), v_map)
    o_spec = pl.BlockSpec((tq, None, None, D), o_map)

    return pl.pallas_call(
        partial(_flash_attn_kernel, factor=factor),
        out_shape=jax.ShapeDtypeStruct((S, B, H, D), q_arr.dtype),
        grid_spec=pltpu.PrefetchScalarGridSpec(
            num_scalar_prefetch=0,
            grid=(B, H, S // tq, S // tkv),       # kv (reduction) axis last
            in_specs=[q_spec, k_spec, v_spec],
            out_specs=o_spec,
            scratch_shapes=[
                pltpu.VMEM((tq, 1), jnp.float32),   # running max  m
                pltpu.VMEM((tq, 1), jnp.float32),   # running sum  l
                pltpu.VMEM((tq, D), jnp.float32),   # output accumulator
            ],
        ),
        compiler_params=pltpu.CompilerParams(
            dimension_semantics=("parallel", "parallel", "parallel", "arbitrary"),
            vmem_limit_bytes=_VMEM_LIMIT),
    )(q_arr, k_arr, v_arr)


# --------------------------------------------------- one-time param relayout --

def prepare_params(params, head_num, head_dim):
    """Hoisted out of the forward: regroup projection-weight rows so heads are
    contiguous (channel = h*D + d, matching the module's
    '(head_dim head_num)' rearrange), pre-transpose to [in, out], build the
    fused QKV weight, and cast matmul operands to bf16.  Call ONCE at load."""
    Wq, bq, Wk, bk, Wv, bv, Wo, bo = params
    H, D = head_num, head_dim
    d_model = Wq.shape[1]

    def group_heads(w, b):
        w = w.reshape(D, H, d_model).transpose(1, 0, 2).reshape(H * D, d_model)
        b = b.reshape(D, H).T.reshape(H * D)
        return w, b

    Wq_g, bq_g = group_heads(Wq, bq)
    Wk_g, bk_g = group_heads(Wk, bk)
    Wv_g, bv_g = group_heads(Wv, bv)

    od = _OPERAND_DTYPE
    return {
        "w_q_t": Wq_g.T.astype(od), "b_q": bq_g.astype(jnp.float32),
        "w_k_t": Wk_g.T.astype(od), "b_k": bk_g.astype(jnp.float32),
        "w_v_t": Wv_g.T.astype(od), "b_v": bv_g.astype(jnp.float32),
        "w_qkv_t": jnp.concatenate([Wq_g, Wk_g, Wv_g], axis=0).T.astype(od),
        "b_qkv": jnp.concatenate([bq_g, bk_g, bv_g], axis=0).astype(jnp.float32),
        # attention-output channel order (h*D + d) already matches W_o columns.
        "w_o_t": Wo.T.astype(od), "b_o": bo.astype(jnp.float32),
    }


# ---------------------------------------------------------------- forward ----

def mha_forward(prepared, query, key, value, head_num, head_dim):
    S, B, d_model = query.shape
    H, D = head_num, head_dim
    factor = 1.0 / math.sqrt(D)
    od = _OPERAND_DTYPE

    if (query is key) and (key is value):
        # Self-attention: one fused QKV projection (x read from HBM once, 3x N).
        x = query.reshape(S * B, d_model).astype(od)
        qkv = pallas_linear(x, prepared["w_qkv_t"], prepared["b_qkv"], od)
        qkv = qkv.reshape(S, B, 3 * H, D)                    # free reshape
        attn = pallas_attention(qkv, qkv, qkv, seq_len=S, batch=B, head_num=H,
                                head_dim=D, factor=factor,
                                head_offsets=(0, H, 2 * H))
    else:
        # Distinct query/key/value tensors: three tiled projections.
        xq = query.reshape(S * B, d_model).astype(od)
        xk = key.reshape(S * B, d_model).astype(od)
        xv = value.reshape(S * B, d_model).astype(od)
        q = pallas_linear(xq, prepared["w_q_t"], prepared["b_q"], od)
        k = pallas_linear(xk, prepared["w_k_t"], prepared["b_k"], od)
        v = pallas_linear(xv, prepared["w_v_t"], prepared["b_v"], od)
        q = q.reshape(S, B, H, D)
        k = k.reshape(S, B, H, D)
        v = v.reshape(S, B, H, D)
        attn = pallas_attention(q, k, v, seq_len=S, batch=B, head_num=H,
                                head_dim=D, factor=factor,
                                head_offsets=(0, 0, 0))

    # 'i b h d -> i b (h d)' is a free reshape in this layout.
    merged = attn.reshape(S * B, H * D)
    out = pallas_linear(merged, prepared["w_o_t"], prepared["b_o"], query.dtype)
    return out.reshape(S, B, d_model)


# pure-JAX f32 reference mirroring the PyTorch forward (correctness check)
def mha_reference(params, query, key, value, head_num, head_dim):
    S, B, d_model = query.shape
    Wq, bq, Wk, bk, Wv, bv, Wo, bo = params
    factor = 1.0 / math.sqrt(head_dim)
    q = query @ Wq.T + bq
    k = key @ Wk.T + bk
    v = value @ Wv.T + bv
    rs = lambda x: jnp.transpose(x.reshape(S, B, head_dim, head_num), (0, 1, 3, 2))
    q, k, v = rs(q), rs(k), rs(v)                              # [S, B, H, D]
    sim = jnp.einsum("ibhd,jbhd->ijbh", q, k) * factor
    attn = jax.nn.softmax(sim, axis=1)
    att = jnp.einsum("ijbh,jbhd->ibhd", attn, v)
    att = att.reshape(S, B, head_num * head_dim)
    return att @ Wo.T + bo


# ------------------------------------------------------------------- main ----

def _linear_params(key, in_f, out_f):
    k1, k2 = jax.random.split(key)
    bound = 1.0 / math.sqrt(in_f)
    W = jax.random.uniform(k1, (out_f, in_f), jnp.float32, -bound, bound)
    b = jax.random.uniform(k2, (out_f,), jnp.float32, -bound, bound)
    return W, b


if __name__ == "__main__":
    d_model, head_num, head_dim = 32, 4, 8
    S, B = 8, 2

    root = jax.random.PRNGKey(0)
    kq, kk, kv, ko, kx1, kx2, kx3 = jax.random.split(root, 7)

    Wq, bq = _linear_params(kq, d_model, head_num * head_dim)
    Wk, bk = _linear_params(kk, d_model, head_num * head_dim)
    Wv, bv = _linear_params(kv, d_model, head_num * head_dim)
    Wo, bo = _linear_params(ko, head_num * head_dim, d_model)
    params = (Wq, bq, Wk, bk, Wv, bv, Wo, bo)

    # one-time weight relayout / bf16 cast (hoisted out of the forward)
    prepared = jax.tree_util.tree_map(jax.block_until_ready,
                                      prepare_params(params, head_num, head_dim))

    query = jax.random.normal(kx1, (S, B, d_model), jnp.float32)
    key = jax.random.normal(kx2, (S, B, d_model), jnp.float32)
    value = jax.random.normal(kx3, (S, B, d_model), jnp.float32)

    # bf16 matmul operands (f32 accumulation) + approx reciprocal => wider budget
    TOL = dict(atol=5e-2, rtol=5e-2)

    # Cross-attention-style call (distinct q/k/v tensors -> separate projections)
    out = jax.block_until_ready(
        mha_forward(prepared, query, key, value, head_num, head_dim))
    ref = mha_reference(params, query, key, value, head_num, head_dim)
    assert out.shape == (S, B, d_model)
    assert jnp.allclose(out, ref, **TOL), "mismatch (cross) vs. reference"

    # Self-attention call (same tensor for q/k/v -> fused QKV projection path)
    out_sa = jax.block_until_ready(
        mha_forward(prepared, query, query, query, head_num, head_dim))
    ref_sa = mha_reference(params, query, query, query, head_num, head_dim)
    assert jnp.allclose(out_sa, ref_sa, **TOL), "mismatch (self) vs. reference"

    print("KERNEL_OK")
</pallas_src>

<mosaic_0001>
module attributes {stable_mosaic.version = 11 : i64} {
  func.func @_linear_kernel(%arg0: i32, %arg1: i32, %arg2: i32, %arg3: memref<16x32xbf16, #tpu.memory_space<vmem>>, %arg4: memref<32x32xbf16, #tpu.memory_space<vmem>>, %arg5: memref<1x32xf32, #tpu.memory_space<vmem>>, %arg6: memref<16x32xbf16, #tpu.memory_space<vmem>>, %arg7: memref<16x32xf32, #tpu.memory_space<vmem>>) attributes {dimension_semantics = [#tpu.dimension_semantics<parallel>, #tpu.dimension_semantics<parallel>, #tpu.dimension_semantics<arbitrary>], iteration_bounds = array<i64: 1, 1, 1>, scalar_prefetch = 0 : i64, scratch_operands = 1 : i64, tpu.core_type = #tpu.core_type<tc>, window_params = [{transform_indices = @transform_0, window_bounds = array<i64: 16, 32>}, {transform_indices = @transform_1, window_bounds = array<i64: 32, 32>}, {transform_indices = @transform_2, window_bounds = array<i64: 1, 32>}, {transform_indices = @transform_3, window_bounds = array<i64: 16, 32>}]} {
    %c0_i32 = arith.constant 0 : i32
    %0 = arith.cmpi eq, %arg2, %c0_i32 : i32
    %1 = arith.extui %0 : i1 to i32
    %c0_i32_0 = arith.constant 0 : i32
    %2 = arith.cmpi ne, %1, %c0_i32_0 : i32
    scf.if %2 {
      %cst_10 = arith.constant 0.000000e+00 : f32
      %12 = vector.broadcast %cst_10 : f32 to vector<16x32xf32>
      %c0_11 = arith.constant 0 : index
      %c0_12 = arith.constant 0 : index
      %13 = vector.load %arg7[%c0_11, %c0_12] : memref<16x32xf32, #tpu.memory_space<vmem>>, vector<16x32xf32>
      tpu.vector_store %arg7[%c0_11, %c0_12], %12 {strides = array<i32>} : memref<16x32xf32, #tpu.memory_space<vmem>>, vector<16x32xf32>,
    } else {
    }
    %c0 = arith.constant 0 : index
    %c0_1 = arith.constant 0 : index
    %3 = vector.load %arg7[%c0, %c0_1] : memref<16x32xf32, #tpu.memory_space<vmem>>, vector<16x32xf32>
    %c0_2 = arith.constant 0 : index
    %c0_3 = arith.constant 0 : index
    %4 = vector.load %arg3[%c0_2, %c0_3] : memref<16x32xbf16, #tpu.memory_space<vmem>>, vector<16x32xbf16>
    %c0_4 = arith.constant 0 : index
    %c0_5 = arith.constant 0 : index
    %5 = vector.load %arg4[%c0_4, %c0_5] : memref<32x32xbf16, #tpu.memory_space<vmem>>, vector<32x32xbf16>
    %cst = arith.constant dense<0.000000e+00> : vector<16x32xf32>
    %6 = tpu.matmul %4, %5, %cst {dimension_numbers = #tpu.dot_dimension_numbers<[1], [0], [0], [1], [0, 0, 1, 1], [], []>} : vector<16x32xbf16>, vector<32x32xbf16>, vector<16x32xf32> -> vector<16x32xf32>
    %7 = arith.addf %3, %6 : vector<16x32xf32>
    %c0_6 = arith.constant 0 : index
    %c0_7 = arith.constant 0 : index
    %8 = vector.load %arg7[%c0_6, %c0_7] : memref<16x32xf32, #tpu.memory_space<vmem>>, vector<16x32xf32>
    tpu.vector_store %arg7[%c0_6, %c0_7], %7 {strides = array<i32>} : memref<16x32xf32, #tpu.memory_space<vmem>>, vector<16x32xf32>,
    %c0_i32_8 = arith.constant 0 : i32
    %9 = arith.cmpi eq, %arg2, %c0_i32_8 : i32
    %10 = arith.extui %9 : i1 to i32
    %c0_i32_9 = arith.constant 0 : i32
    %11 = arith.cmpi ne, %10, %c0_i32_9 : i32
    scf.if %11 {
      %c0_10 = arith.constant 0 : index
      %c0_11 = arith.constant 0 : index
      %12 = vector.load %arg7[%c0_10, %c0_11] : memref<16x32xf32, #tpu.memory_space<vmem>>, vector<16x32xf32>
      %c0_12 = arith.constant 0 : index
      %c0_13 = arith.constant 0 : index
      %13 = vector.load %arg5[%c0_12, %c0_13] : memref<1x32xf32, #tpu.memory_space<vmem>>, vector<1x32xf32>
      %14 = vector.broadcast %13 : vector<1x32xf32> to vector<16x32xf32>
      %15 = arith.addf %12, %14 : vector<16x32xf32>
      %16 = arith.truncf %15 : vector<16x32xf32> to vector<16x32xbf16>
      %c0_14 = arith.constant 0 : index
      %c0_15 = arith.constant 0 : index
      %17 = vector.load %arg6[%c0_14, %c0_15] : memref<16x32xbf16, #tpu.memory_space<vmem>>, vector<16x32xbf16>
      tpu.vector_store %arg6[%c0_14, %c0_15], %16 {strides = array<i32>} : memref<16x32xbf16, #tpu.memory_space<vmem>>, vector<16x32xbf16>,
    } else {
    }
    return
  }
  func.func @transform_0(%arg0: i32, %arg1: i32, %arg2: i32) -> (i32, i32) {
    %c0_i32 = arith.constant 0 : i32
    return %arg0, %arg2 : i32, i32
  }
  func.func @transform_1(%arg0: i32, %arg1: i32, %arg2: i32) -> (i32, i32) {
    %c0_i32 = arith.constant 0 : i32
    return %arg2, %arg1 : i32, i32
  }
  func.func @transform_2(%arg0: i32, %arg1: i32, %arg2: i32) -> (i32, i32) {
    %c0_i32 = arith.constant 0 : i32
    %c0_i32_0 = arith.constant 0 : i32
    return %c0_i32, %arg1 : i32, i32
  }
  func.func @transform_3(%arg0: i32, %arg1: i32, %arg2: i32) -> (i32, i32) {
    %c0_i32 = arith.constant 0 : i32
    return %arg0, %arg1 : i32, i32
  }
}

</mosaic_0001>

<bundles_post_ra>
// kernel: tpu_custom_call.1
= control target key start
LH: loop header
LB: loop body
LE: loop exit
PB: predicated region body
PF: predicated region fallthrough
CT: control target
= control target key end

     0   :  { %8 = vsyncpa [#allocation4], 0  ;;  %s401_s0 = inlined_call_operand.hbm [shape: bf16[16,32], index: 0, kind: input, shape index: {}]   ;;  %s402_s1 = inlined_call_operand.hbm [shape: bf16[32,32], index: 1, kind: input, shape index: {}]   ;;  %s403_s2 = inlined_call_operand.hbm [shape: f32[1,32], index: 2, kind: input, shape index: {}]   ;;  %s404_s3 = inlined_call_operand.hbm [shape: bf16[16,32], index: 3, kind: output, shape index: {}]  }
   0x1   :  { %9 = vsyncpa [#allocation7], 0 }
   0x2   :  { %10 = vsyncpa [#allocation5], 0  ;;  %s304_s12 = smov [#allocation6]   ;;  %s305_s14 = smov [#allocation3]  }
   0x3   :  { %s28_s13 = sshll.u32 %s304_s12, 4  ;;  %s16_s15 = sshll.u32 %s305_s14, 4  ;;  %s29_s13 = int_to_ptr.vmem [resolvable:$true] %s28_s13  ;;  %s332_s15 = int_to_ptr.vmem [resolvable:$true] %s16_s15 }
   0x4   :  { %s210_s18 = scalar_lea.hbm %s402_s1, 256 }
   0x5   :  { %p211_p0 = scmp.ne.s32.totalorder %s402_s1, %s210_s18  ;;  %p214_p1 = scmp.lt.u32.totalorder %s210_s18, %s402_s1 }
   0x7   :  { %p216_p2 = pnand %p214_p1, %p211_p0 }
   0x9   :  { %219 = shalt.err (!%p216_p2)
}
   0xa   :  { %s220_s23 = scalar_lea.vmem %s29_s13, 256  ;;  %p225_p4 = scmp.lt.s32.totalorder %s29_s13, %s29_s13 }
   0xb   :  { %p221_p3 = scmp.ne.s32.totalorder %s29_s13, %s220_s23  ;;  %p226_p5 = scmp.lt.s32.totalorder %s220_s23, %s220_s23 }
   0xd   :  { %p227_p6 = por %p226_p5, %p225_p4 }
   0xf   :  { %p228_p7 = pnand %p227_p6, %p221_p3 }
  0x11   :  { %231 = shalt.err (!%p228_p7)
}
  0x12   :  { %s306_s24 = smov 64   ;;  %s307_s25 = smov 4  }
  0x13   :  { %34 = dma.hbm_to_vmem [thread:$0]  %s402_s1, 256, %s29_s13, [#allocation7], %s306_s24, %s306_s24, %s307_s25  }
  0x14   :  { %s232_s30 = scalar_lea.hbm %s401_s0, 128 }
  0x15   :  { %p233_p8 = scmp.ne.s32.totalorder %s401_s0, %s232_s30  ;;  %p236_p9 = scmp.lt.u32.totalorder %s232_s30, %s401_s0 }
  0x17   :  { %p238_p10 = pnand %p236_p9, %p233_p8 }
  0x19   :  { %241 = shalt.err (!%p238_p10)
}
  0x1a   :  { %s242_s8 = scalar_lea.vmem %s332_s15, 128  ;;  %p247_p12 = scmp.lt.s32.totalorder %s332_s15, %s332_s15 }
  0x1b   :  { %p243_p11 = scmp.ne.s32.totalorder %s332_s15, %s242_s8  ;;  %p248_p13 = scmp.lt.s32.totalorder %s242_s8, %s242_s8 }
  0x1d   :  { %p249_p0 = por %p248_p13, %p247_p12 }
  0x1f   :  { %p250_p1 = pnand %p249_p0, %p243_p11 }
  0x21   :  { %253 = shalt.err (!%p250_p1)
}
  0x22   :  { %22 = dma.hbm_to_vmem [thread:$0]  %s401_s0, 128, %s332_s15, [#allocation4], %s306_s24, %s306_s24, %s307_s25  }
  0x23   :  { %s308_s10 = smov [#allocation8]   ;;  %s254_s14 = scalar_lea.hbm %s403_s2, 16 }
  0x24   :  { %s41_s11 = sshll.u32 %s308_s10, 4  ;;  %p255_p2 = scmp.ne.s32.totalorder %s403_s2, %s254_s14  ;;  %s42_s11 = int_to_ptr.vmem [resolvable:$true] %s41_s11 }
  0x25   :  { %p258_p3 = scmp.lt.u32.totalorder %s254_s14, %s403_s2 }
  0x27   :  { %p260_p4 = pnand %p258_p3, %p255_p2 }
  0x29   :  { %263 = shalt.err (!%p260_p4)
}
  0x2a   :  { %s264_s20 = scalar_lea.vmem %s42_s11, 16  ;;  %s268_s0 = scalar_lea.vmem %s42_s11, 32 }
  0x2b   :  { %p265_p5 = scmp.ne.s32.totalorder %s42_s11, %s264_s20  ;;  %p269_p6 = scmp.lt.s32.totalorder %s42_s11, %s42_s11 }
  0x2c   :  { %p270_p7 = scmp.lt.s32.totalorder %s268_s0, %s264_s20 }
  0x2e   :  { %p271_p8 = por %p270_p7, %p269_p6 }
  0x30   :  { %p272_p9 = pnand %p271_p8, %p265_p5 }
  0x32   :  { %275 = shalt.err (!%p272_p9)
}
  0x33   :  { %44 = dma.hbm_to_vmem [thread:$0]  %s403_s2, 16, %s42_s11, [#allocation7]  }
  0x34   :  { %298 = dma.done.wait [#allocation4], 128  }
  0x35   :  { %299 = vsyncadd [#allocation4], 4294967168 }
  0x36   :  { %300 = dma.done.wait [#allocation7], 272  }
  0x37   :  { %301 = vsyncadd [#allocation7], 4294967024  ;;  %vm59_vm0 = vcmask 261120   ;;  %v309_v0 = vmov 0.0   ;;  %vm310_vm1 = vmmov 0   ;;  %v207_v1 = vld [vmem:[#allocation6] sm:$0xff]  }
  0x38   :  { %191 = vmatprep.subr.bf16.mxu0 %v309_v0  ;;  %195 = vmatprep.mubr.msk.bf16.mxu0 %vm310_vm1, %v309_v0  ;;  %60 = vst.msk [vmem:[#allocation2] sm:$0xff] %vm59_vm0, %v309_v0  ;;  %61 = vst.msk [vmem:[#allocation2 + $0x8] sm:$0xff] %vm59_vm0, %v309_v0  ;;  %v208_v2 = vld [vmem:[#allocation6 + $0x8] sm:$0xff]   ;;  %v209_v3 = vld [vmem:[#allocation3] sm:$0xff]   ;;  %vm158_vm2 = vcmask 257024   ;;  %s311_s2 = smov [#allocation9]  }
  0x39   :  { %192 = vmatpush3.bf16.msra.mxu0 %v207_v1  ;;  %v183_v12 = vld [vmem:[#allocation8] ss:$0 sm:$0xff]  ;;  %s166_s22 = sshll.u32 %s311_s2, 4  ;;  %s167_s22 = int_to_ptr.vmem [resolvable:$true] %s166_s22 }
  0x3a   :  { %193 = vmatprep.subr.bf16.mxu0 %v309_v0  ;;  %s276_s23 = scalar_lea.vmem %s167_s22, 128  ;;  %p281_p11 = scmp.lt.s32.totalorder %s167_s22, %s167_s22 }
  0x3b   :  { %p277_p10 = scmp.ne.s32.totalorder %s167_s22, %s276_s23  ;;  %p282_p12 = scmp.lt.s32.totalorder %s276_s23, %s276_s23 }
  0x3d   :  { %194 = vmatpush3.bf16.msra.mxu0 %v208_v2  ;;  %p283_p13 = por %p282_p12, %p281_p11 }
  0x3f   :  { %v62_v4 = vld [vmem:[#allocation2] sm:$0xff]  ;;  %v63_v6 = vld [vmem:[#allocation2 + $0x8] sm:$0xff]  ;;  %p284_p0 = pnand %p283_p13, %p277_p10 }
  0x40   :  { %196 = vmatmul.mubr.msk.bf16.vlgmr.msra.gmra.mrb[0].mxu0 %vm59_vm0, %v209_v3 }
 0x113   :  { %v125_v5 = vpop.f32.mrb[0].mxu0 }
 0x114   :  { %v132_v7 = vadd.f32 %v125_v5, %v62_v4  ;;  %v197_v8 = vpop.f32.mrb[1].mxu0 }
 0x115   :  { %v128_v9 = vpop.f32.mrb[2].mxu0 }
 0x116   :  { %134 = vst.msk [vmem:[#allocation2] sm:$0xff] %vm59_vm0, %v132_v7  ;;  %v133_v10 = vadd.f32 %v128_v9, %v63_v6  ;;  %v198_v11 = vpop.f32.mrb[3].mxu0 }
 0x118   :  { %135 = vst.msk [vmem:[#allocation2 + $0x8] sm:$0xff] %vm59_vm0, %v133_v10 }
 0x11d   :  { %v139_v13 = vld [vmem:[#allocation2] sm:$0xff] }
 0x11e   :  { %v148_v14 = vadd.f32 %v183_v12, %v139_v13 }
 0x11f   :  { %v140_v15 = vld [vmem:[#allocation2 + $0x8] sm:$0xff] }
 0x120   :  { %v149_v16 = vadd.f32 %v183_v12, %v140_v15  ;;  %v186_v17 = vpack.c.bf16 %v148_v14, %v148_v14 }
 0x122   :  { %v187_v18 = vpack.c.bf16 %v149_v16, %v149_v16  ;;  %159 = vst.msk [vmem:[#allocation9] sm:$0xf] %vm158_vm2, %v186_v17 }
 0x124   :  { %160 = vst.msk [vmem:[#allocation9 + $0x4] sm:$0xf] %vm158_vm2, %v187_v18 }
 0x125   :  { %287 = shalt.err (!%p284_p0)
}
 0x126   :  { %s288_s28 = scalar_lea.hbm %s404_s3, 128 }
 0x127   :  { %p289_p1 = scmp.ne.s32.totalorder %s404_s3, %s288_s28  ;;  %p292_p2 = scmp.lt.u32.totalorder %s288_s28, %s404_s3 }
 0x129   :  { %p294_p3 = pnand %p292_p2, %p289_p1 }
 0x12b   :  { %297 = shalt.err (!%p294_p3)
}
 0x12c   :  { %172 = dma.vmem_to_hbm [thread:$0]  %s167_s22, 128, %s404_s3, [#allocation5], %s306_s24, %s306_s24, %s307_s25  }
 0x12d   :  { %302 = dma.done.wait [#allocation5], 128  }
 0x12e   :  { %303 = vsyncadd [#allocation5], 4294967168 }
 0x12f   :  { %176 = vsyncpa [#allocation4], 1 }
 0x130   :  { %177 = vsyncpa [#allocation7], 1 }
 0x131   :  { %178 = vsyncpa [#allocation5], 1 }

</bundles_post_ra>
